<compile_context>
chip_gen: v7x
topology: tpu7x:2x2x1
jax: 0.10.0
libtpu: 0.0.40
codegen_flags: <defaults>
</compile_context>

<pallas_src>
import jax
import jax.numpy as jnp
import numpy as np
from jax.experimental import pallas as pl
from jax.experimental.pallas import tpu as pltpu

_BN_EPS = 1e-5
_LANE = 128


def _round_up(v, m):
    return (v + m - 1) // m * m


# ---------------------------------------------------------------------------
# Fused kernel factory (static layer structure baked in, loop fully unrolled)
# ---------------------------------------------------------------------------
def _make_fused_generator_kernel(emb_pad, res_pads):
    """Kernel ref order:
        x, (w_1, gamma_1, beta_1), ..., (w_L, gamma_L, beta_L), wf, bf,
        o_ref, acts_scratch
    Weights are pre-transposed to (in, out) with rows re-packed to the
    scratch's append order [x, out_1, ..., out_k] and zero rows/cols for the
    lane padding.  Residual biases are not passed (BN batch-mean cancels them).
    """
    L = len(res_pads)

    def kernel(*refs):
        x_ref = refs[0]
        wf_ref = refs[1 + 3 * L]
        bf_ref = refs[2 + 3 * L]
        o_ref = refs[3 + 3 * L]
        acts_ref = refs[4 + 3 * L]

        # Residual stack: compute once (first output tile), keep in VMEM scratch.
        @pl.when(pl.program_id(0) == 0)
        def _():
            # Stage x into lane range [0, emb_pad) of the activation slab.
            acts_ref[:, :emb_pad] = x_ref[...]
            cur = emb_pad
            for li in range(L):
                w_ref = refs[1 + 3 * li]
                g_ref = refs[2 + 3 * li]
                be_ref = refs[3 + 3 * li]
                dpad = res_pads[li]

                # Single lane-dense dot over the live prefix of the slab
                # (the "virtual concat") -- residual bias dropped: it is
                # cancelled exactly by the batch-mean subtraction below.
                a = acts_ref[:, :cur]
                h = jnp.dot(a, w_ref[...], preferred_element_type=jnp.float32)

                # BatchNorm1d with batch statistics (biased variance),
                # one-pass variance, affine applied as one scale/shift.
                mean = jnp.mean(h, axis=0, keepdims=True)
                var = jnp.maximum(
                    jnp.mean(h * h, axis=0, keepdims=True) - mean * mean, 0.0)
                scale = g_ref[...] * jax.lax.rsqrt(var + _BN_EPS)
                hn = (h - mean) * scale + be_ref[...]

                # ReLU, single lane-dense segment store (append order).
                acts_ref[:, cur:cur + dpad] = jnp.maximum(hn, 0.0)
                cur += dpad

        # Final Linear for this output-column tile (lane-dense store to HBM).
        y = jnp.dot(acts_ref[...], wf_ref[...],
                    preferred_element_type=jnp.float32) + bf_ref[...]
        o_ref[...] = y.astype(o_ref.dtype)

    return kernel


# ---------------------------------------------------------------------------
# Parameter construction (mirrors nn.Linear / fresh BatchNorm1d init).
# Weight rows are in PyTorch concat order [out_{k-1}, ..., out_1, x].
# ---------------------------------------------------------------------------
def init_generator_params(key, embedding_dim, generator_dim, data_dim):
    params = {"residuals": []}
    dim = embedding_dim
    for item in generator_dim:
        key, kw, kb = jax.random.split(key, 3)
        bound = 1.0 / np.sqrt(dim)
        params["residuals"].append({
            "w": jax.random.uniform(kw, (dim, item), jnp.float32, -bound, bound),
            "b": jax.random.uniform(kb, (1, item), jnp.float32, -bound, bound),
            "gamma": jnp.ones((1, item), jnp.float32),   # fresh BN affine
            "beta": jnp.zeros((1, item), jnp.float32),
        })
        dim += item
    key, kw, kb = jax.random.split(key, 3)
    bound = 1.0 / np.sqrt(dim)
    params["final"] = {
        "w": jax.random.uniform(kw, (dim, data_dim), jnp.float32, -bound, bound),
        "b": jax.random.uniform(kb, (1, data_dim), jnp.float32, -bound, bound),
    }
    return params


# ---------------------------------------------------------------------------
# Weight re-packing: concat-order rows -> lane-padded append-order rows.
# ---------------------------------------------------------------------------
def _repack_rows(w, n_prev_outs, emb, res_dims, emb_pad, res_pads, out_pad):
    """w: (emb + sum(res_dims[:n_prev_outs]), out_data), rows in PyTorch concat
    order [out_{n-1}, ..., out_0, x].  Returns a zero-padded weight of shape
    (emb_pad + sum(res_pads[:n_prev_outs]), out_pad) whose rows sit at the
    append-order segment offsets [x, out_0, ..., out_{n-1}] used by the
    kernel's activation slab."""
    in_pad = emb_pad + sum(res_pads[:n_prev_outs])
    out_data = w.shape[1]
    W = jnp.zeros((in_pad, out_pad), w.dtype)
    src = 0
    for prev in range(n_prev_outs - 1, -1, -1):       # newest segment first
        d = res_dims[prev]
        dst = emb_pad + sum(res_pads[:prev])
        W = W.at[dst:dst + d, :out_data].set(w[src:src + d, :])
        src += d
    W = W.at[:emb, :out_data].set(w[src:src + emb, :])
    return W


# ---------------------------------------------------------------------------
# Wrapper: one fused pallas_call for the entire forward pass
# ---------------------------------------------------------------------------
def generator_forward(params, x):
    n, emb = x.shape
    res_dims = [int(p["w"].shape[1]) for p in params["residuals"]]
    L = len(res_dims)

    emb_pad = _round_up(emb, _LANE)
    res_pads = [_round_up(d, _LANE) for d in res_dims]
    total_pad = emb_pad + sum(res_pads)

    data_dim = int(params["final"]["w"].shape[1])
    d_pad = _round_up(data_dim, _LANE)

    # Output-column tile for the final projection (pipelined grid axis).
    tn = _LANE
    for cand in (512, 256, 128):
        if d_pad % cand == 0:
            tn = cand
            break
    n_tiles = d_pad // tn

    # Lane-pad x once (zero columns; matching weight rows are zero).
    x_p = x if emb_pad == emb else jnp.pad(x, ((0, 0), (0, emb_pad - emb)))

    args = [x_p]
    in_specs = [pl.BlockSpec((n, emb_pad), lambda j: (0, 0))]
    for li, p in enumerate(params["residuals"]):
        d = res_dims[li]
        dpad = res_pads[li]
        in_pad = emb_pad + sum(res_pads[:li])
        w_p = _repack_rows(p["w"], li, emb, res_dims, emb_pad, res_pads, dpad)
        g_p = jnp.ones((1, dpad), jnp.float32).at[:, :d].set(p["gamma"])
        be_p = jnp.zeros((1, dpad), jnp.float32).at[:, :d].set(p["beta"])
        # NOTE: residual bias p["b"] intentionally NOT passed (no-op under BN).
        args += [w_p, g_p, be_p]
        in_specs += [
            pl.BlockSpec((in_pad, dpad), lambda j: (0, 0)),
            pl.BlockSpec((1, dpad), lambda j: (0, 0)),
            pl.BlockSpec((1, dpad), lambda j: (0, 0)),
        ]

    wf_p = _repack_rows(params["final"]["w"], L, emb, res_dims,
                        emb_pad, res_pads, d_pad)
    bf_p = jnp.zeros((1, d_pad), jnp.float32).at[:, :data_dim].set(
        params["final"]["b"])
    args += [wf_p, bf_p]
    in_specs += [
        pl.BlockSpec((total_pad, tn), lambda j: (0, j)),
        pl.BlockSpec((1, tn), lambda j: (0, j)),
    ]
    out_spec = pl.BlockSpec((n, tn), lambda j: (0, j))

    # VMEM budget: resident activations + weights + double-buffered tiles.
    fb = 4
    est = n * total_pad * fb                      # activation scratch
    est += 2 * n * emb_pad * fb                   # x
    for li in range(L):
        in_pad = emb_pad + sum(res_pads[:li])
        est += 2 * (in_pad + 2) * res_pads[li] * fb
    est += 2 * (total_pad + 1) * tn * fb          # wf / bf tiles
    est += 2 * n * tn * fb                        # out tile
    vmem_limit = int(min(64 * 2**20, max(32 * 2**20, 2 * est)))

    kernel = _make_fused_generator_kernel(emb_pad, tuple(res_pads))
    out_p = pl.pallas_call(
        kernel,
        out_shape=jax.ShapeDtypeStruct((n, d_pad), x.dtype),
        grid=(n_tiles,),
        in_specs=in_specs,
        out_specs=out_spec,
        scratch_shapes=[pltpu.VMEM((n, total_pad), jnp.float32)],
        compiler_params=pltpu.CompilerParams(
            dimension_semantics=("arbitrary",),   # scratch carried across tiles
            vmem_limit_bytes=vmem_limit),
    )(*args)

    # Skip the re-read/re-write slice entirely when data_dim is 128-aligned.
    return out_p if d_pad == data_dim else out_p[:, :data_dim]


# ---------------------------------------------------------------------------
# Pure-JAX reference (exact PyTorch semantics, incl. residual biases + affine)
# ---------------------------------------------------------------------------
def generator_reference(params, x):
    h = x
    for p in params["residuals"]:
        lin = h @ p["w"] + p["b"]
        mean = jnp.mean(lin, axis=0, keepdims=True)
        var = jnp.mean((lin - mean) ** 2, axis=0, keepdims=True)
        bn = (lin - mean) * jax.lax.rsqrt(var + _BN_EPS) * p["gamma"] + p["beta"]
        out = jnp.maximum(bn, 0.0)
        h = jnp.concatenate([out, h], axis=1)
    return h @ params["final"]["w"] + params["final"]["b"]


# ---------------------------------------------------------------------------
if __name__ == "__main__":
    embedding_dim = 32
    generator_dim = (32, 32)
    data_dim = 16
    batch = 8

    key = jax.random.PRNGKey(0)
    key, kx = jax.random.split(key)
    x = jax.random.normal(kx, (batch, embedding_dim), jnp.float32)

    params = init_generator_params(key, embedding_dim, generator_dim, data_dim)

    out = generator_forward(params, x)
    out = jax.block_until_ready(out)

    ref = generator_reference(params, x)
    np.testing.assert_allclose(np.asarray(out), np.asarray(ref),
                               rtol=1e-4, atol=1e-4)
    assert out.shape == (batch, data_dim)

    print("KERNEL_OK")
</pallas_src>

<mosaic_0001>
module attributes {stable_mosaic.version = 11 : i64} {
  func.func @kernel(%arg0: i32, %arg1: memref<8x128xf32, #tpu.memory_space<vmem>>, %arg2: memref<128x128xf32, #tpu.memory_space<vmem>>, %arg3: memref<1x128xf32, #tpu.memory_space<vmem>>, %arg4: memref<1x128xf32, #tpu.memory_space<vmem>>, %arg5: memref<256x128xf32, #tpu.memory_space<vmem>>, %arg6: memref<1x128xf32, #tpu.memory_space<vmem>>, %arg7: memref<1x128xf32, #tpu.memory_space<vmem>>, %arg8: memref<384x128xf32, #tpu.memory_space<vmem>>, %arg9: memref<1x128xf32, #tpu.memory_space<vmem>>, %arg10: memref<8x128xf32, #tpu.memory_space<vmem>>, %arg11: memref<8x384xf32, #tpu.memory_space<vmem>>) attributes {dimension_semantics = [#tpu.dimension_semantics<arbitrary>], iteration_bounds = array<i64: 1>, scalar_prefetch = 0 : i64, scratch_operands = 1 : i64, tpu.core_type = #tpu.core_type<tc>, window_params = [{pipeline_mode = #tpu.pipeline_mode<synchronous>, transform_indices = @transform_0, window_bounds = array<i64: 8, 128>}, {pipeline_mode = #tpu.pipeline_mode<synchronous>, transform_indices = @transform_1, window_bounds = array<i64: 128, 128>}, {pipeline_mode = #tpu.pipeline_mode<synchronous>, transform_indices = @transform_2, window_bounds = array<i64: 1, 128>}, {pipeline_mode = #tpu.pipeline_mode<synchronous>, transform_indices = @transform_3, window_bounds = array<i64: 1, 128>}, {pipeline_mode = #tpu.pipeline_mode<synchronous>, transform_indices = @transform_4, window_bounds = array<i64: 256, 128>}, {pipeline_mode = #tpu.pipeline_mode<synchronous>, transform_indices = @transform_5, window_bounds = array<i64: 1, 128>}, {pipeline_mode = #tpu.pipeline_mode<synchronous>, transform_indices = @transform_6, window_bounds = array<i64: 1, 128>}, {transform_indices = @transform_7, window_bounds = array<i64: 384, 128>}, {transform_indices = @transform_8, window_bounds = array<i64: 1, 128>}, {transform_indices = @transform_9, window_bounds = array<i64: 8, 128>}]} {
    %c0_i32 = arith.constant 0 : i32
    %0 = arith.cmpi eq, %arg0, %c0_i32 : i32
    %1 = arith.extui %0 : i1 to i32
    %c0_i32_0 = arith.constant 0 : i32
    %2 = arith.cmpi ne, %1, %c0_i32_0 : i32
    scf.if %2 {
      %c0_8 = arith.constant 0 : index
      %c0_9 = arith.constant 0 : index
      %10 = vector.load %arg1[%c0_8, %c0_9] : memref<8x128xf32, #tpu.memory_space<vmem>>, vector<8x128xf32>
      %c0_10 = arith.constant 0 : index
      %c0_11 = arith.constant 0 : index
      %11 = vector.load %arg11[%c0_10, %c0_11] : memref<8x384xf32, #tpu.memory_space<vmem>>, vector<8x128xf32>
      tpu.vector_store %arg11[%c0_10, %c0_11], %10 {strides = array<i32>} : memref<8x384xf32, #tpu.memory_space<vmem>>, vector<8x128xf32>,
      %c0_12 = arith.constant 0 : index
      %c0_13 = arith.constant 0 : index
      %12 = vector.load %arg11[%c0_12, %c0_13] : memref<8x384xf32, #tpu.memory_space<vmem>>, vector<8x128xf32>
      %c0_14 = arith.constant 0 : index
      %c0_15 = arith.constant 0 : index
      %13 = vector.load %arg2[%c0_14, %c0_15] : memref<128x128xf32, #tpu.memory_space<vmem>>, vector<128x128xf32>
      %cst_16 = arith.constant dense<0.000000e+00> : vector<8x128xf32>
      %14 = tpu.matmul %12, %13, %cst_16 {dimension_numbers = #tpu.dot_dimension_numbers<[1], [0], [0], [1], [0, 0, 1, 1], [], []>} : vector<8x128xf32>, vector<128x128xf32>, vector<8x128xf32> -> vector<8x128xf32>
      %cst_17 = arith.constant dense<0.000000e+00> : vector<128xf32>
      %15 = vector.multi_reduction <add>, %14, %cst_17 [0] : vector<8x128xf32> to vector<128xf32>
      %16 = vector.shape_cast %15 : vector<128xf32> to vector<1x128xf32>
      %cst_18 = arith.constant 8.000000e+00 : f32
      %17 = vector.broadcast %cst_18 : f32 to vector<1x128xf32>
      %18 = arith.divf %16, %17 : vector<1x128xf32>
      %19 = arith.mulf %14, %14 : vector<8x128xf32>
      %cst_19 = arith.constant dense<0.000000e+00> : vector<128xf32>
      %20 = vector.multi_reduction <add>, %19, %cst_19 [0] : vector<8x128xf32> to vector<128xf32>
      %21 = vector.shape_cast %20 : vector<128xf32> to vector<1x128xf32>
      %cst_20 = arith.constant 8.000000e+00 : f32
      %22 = vector.broadcast %cst_20 : f32 to vector<1x128xf32>
      %23 = arith.divf %21, %22 : vector<1x128xf32>
      %24 = arith.mulf %18, %18 : vector<1x128xf32>
      %25 = arith.subf %23, %24 : vector<1x128xf32>
      %cst_21 = arith.constant 0.000000e+00 : f32
      %26 = vector.broadcast %cst_21 : f32 to vector<1x128xf32>
      %27 = arith.maximumf %25, %26 : vector<1x128xf32>
      %c0_22 = arith.constant 0 : index
      %c0_23 = arith.constant 0 : index
      %28 = vector.load %arg3[%c0_22, %c0_23] : memref<1x128xf32, #tpu.memory_space<vmem>>, vector<1x128xf32>
      %cst_24 = arith.constant 9.99999974E-6 : f32
      %29 = vector.broadcast %cst_24 : f32 to vector<1x128xf32>
      %30 = arith.addf %27, %29 : vector<1x128xf32>
      %31 = math.rsqrt %30 : vector<1x128xf32>
      %32 = arith.mulf %28, %31 : vector<1x128xf32>
      %33 = vector.broadcast %18 : vector<1x128xf32> to vector<8x128xf32>
      %34 = arith.subf %14, %33 : vector<8x128xf32>
      %35 = vector.broadcast %32 : vector<1x128xf32> to vector<8x128xf32>
      %36 = arith.mulf %34, %35 : vector<8x128xf32>
      %c0_25 = arith.constant 0 : index
      %c0_26 = arith.constant 0 : index
      %37 = vector.load %arg4[%c0_25, %c0_26] : memref<1x128xf32, #tpu.memory_space<vmem>>, vector<1x128xf32>
      %38 = vector.broadcast %37 : vector<1x128xf32> to vector<8x128xf32>
      %39 = arith.addf %36, %38 : vector<8x128xf32>
      %cst_27 = arith.constant 0.000000e+00 : f32
      %40 = vector.broadcast %cst_27 : f32 to vector<8x128xf32>
      %41 = arith.maximumf %39, %40 : vector<8x128xf32>
      %c0_28 = arith.constant 0 : index
      %c128 = arith.constant 128 : index
      %42 = vector.load %arg11[%c0_28, %c128] : memref<8x384xf32, #tpu.memory_space<vmem>>, vector<8x128xf32>
      tpu.vector_store %arg11[%c0_28, %c128], %41 {strides = array<i32>} : memref<8x384xf32, #tpu.memory_space<vmem>>, vector<8x128xf32>,
      %c0_29 = arith.constant 0 : index
      %c0_30 = arith.constant 0 : index
      %43 = vector.load %arg11[%c0_29, %c0_30] : memref<8x384xf32, #tpu.memory_space<vmem>>, vector<8x256xf32>
      %c0_31 = arith.constant 0 : index
      %c0_32 = arith.constant 0 : index
      %44 = vector.load %arg5[%c0_31, %c0_32] : memref<256x128xf32, #tpu.memory_space<vmem>>, vector<256x128xf32>
      %cst_33 = arith.constant dense<0.000000e+00> : vector<8x128xf32>
      %45 = tpu.matmul %43, %44, %cst_33 {dimension_numbers = #tpu.dot_dimension_numbers<[1], [0], [0], [1], [0, 0, 1, 1], [], []>} : vector<8x256xf32>, vector<256x128xf32>, vector<8x128xf32> -> vector<8x128xf32>
      %cst_34 = arith.constant dense<0.000000e+00> : vector<128xf32>
      %46 = vector.multi_reduction <add>, %45, %cst_34 [0] : vector<8x128xf32> to vector<128xf32>
      %47 = vector.shape_cast %46 : vector<128xf32> to vector<1x128xf32>
      %cst_35 = arith.constant 8.000000e+00 : f32
      %48 = vector.broadcast %cst_35 : f32 to vector<1x128xf32>
      %49 = arith.divf %47, %48 : vector<1x128xf32>
      %50 = arith.mulf %45, %45 : vector<8x128xf32>
      %cst_36 = arith.constant dense<0.000000e+00> : vector<128xf32>
      %51 = vector.multi_reduction <add>, %50, %cst_36 [0] : vector<8x128xf32> to vector<128xf32>
      %52 = vector.shape_cast %51 : vector<128xf32> to vector<1x128xf32>
      %cst_37 = arith.constant 8.000000e+00 : f32
      %53 = vector.broadcast %cst_37 : f32 to vector<1x128xf32>
      %54 = arith.divf %52, %53 : vector<1x128xf32>
      %55 = arith.mulf %49, %49 : vector<1x128xf32>
      %56 = arith.subf %54, %55 : vector<1x128xf32>
      %cst_38 = arith.constant 0.000000e+00 : f32
      %57 = vector.broadcast %cst_38 : f32 to vector<1x128xf32>
      %58 = arith.maximumf %56, %57 : vector<1x128xf32>
      %c0_39 = arith.constant 0 : index
      %c0_40 = arith.constant 0 : index
      %59 = vector.load %arg6[%c0_39, %c0_40] : memref<1x128xf32, #tpu.memory_space<vmem>>, vector<1x128xf32>
      %cst_41 = arith.constant 9.99999974E-6 : f32
      %60 = vector.broadcast %cst_41 : f32 to vector<1x128xf32>
      %61 = arith.addf %58, %60 : vector<1x128xf32>
      %62 = math.rsqrt %61 : vector<1x128xf32>
      %63 = arith.mulf %59, %62 : vector<1x128xf32>
      %64 = vector.broadcast %49 : vector<1x128xf32> to vector<8x128xf32>
      %65 = arith.subf %45, %64 : vector<8x128xf32>
      %66 = vector.broadcast %63 : vector<1x128xf32> to vector<8x128xf32>
      %67 = arith.mulf %65, %66 : vector<8x128xf32>
      %c0_42 = arith.constant 0 : index
      %c0_43 = arith.constant 0 : index
      %68 = vector.load %arg7[%c0_42, %c0_43] : memref<1x128xf32, #tpu.memory_space<vmem>>, vector<1x128xf32>
      %69 = vector.broadcast %68 : vector<1x128xf32> to vector<8x128xf32>
      %70 = arith.addf %67, %69 : vector<8x128xf32>
      %cst_44 = arith.constant 0.000000e+00 : f32
      %71 = vector.broadcast %cst_44 : f32 to vector<8x128xf32>
      %72 = arith.maximumf %70, %71 : vector<8x128xf32>
      %c0_45 = arith.constant 0 : index
      %c256 = arith.constant 256 : index
      %73 = vector.load %arg11[%c0_45, %c256] : memref<8x384xf32, #tpu.memory_space<vmem>>, vector<8x128xf32>
      tpu.vector_store %arg11[%c0_45, %c256], %72 {strides = array<i32>} : memref<8x384xf32, #tpu.memory_space<vmem>>, vector<8x128xf32>,
    } else {
    }
    %c0 = arith.constant 0 : index
    %c0_1 = arith.constant 0 : index
    %3 = vector.load %arg11[%c0, %c0_1] : memref<8x384xf32, #tpu.memory_space<vmem>>, vector<8x384xf32>
    %c0_2 = arith.constant 0 : index
    %c0_3 = arith.constant 0 : index
    %4 = vector.load %arg8[%c0_2, %c0_3] : memref<384x128xf32, #tpu.memory_space<vmem>>, vector<384x128xf32>
    %cst = arith.constant dense<0.000000e+00> : vector<8x128xf32>
    %5 = tpu.matmul %3, %4, %cst {dimension_numbers = #tpu.dot_dimension_numbers<[1], [0], [0], [1], [0, 0, 1, 1], [], []>} : vector<8x384xf32>, vector<384x128xf32>, vector<8x128xf32> -> vector<8x128xf32>
    %c0_4 = arith.constant 0 : index
    %c0_5 = arith.constant 0 : index
    %6 = vector.load %arg9[%c0_4, %c0_5] : memref<1x128xf32, #tpu.memory_space<vmem>>, vector<1x128xf32>
    %7 = vector.broadcast %6 : vector<1x128xf32> to vector<8x128xf32>
    %8 = arith.addf %5, %7 : vector<8x128xf32>
    %c0_6 = arith.constant 0 : index
    %c0_7 = arith.constant 0 : index
    %9 = vector.load %arg10[%c0_6, %c0_7] : memref<8x128xf32, #tpu.memory_space<vmem>>, vector<8x128xf32>
    tpu.vector_store %arg10[%c0_6, %c0_7], %8 {strides = array<i32>} : memref<8x128xf32, #tpu.memory_space<vmem>>, vector<8x128xf32>,
    return
  }
  func.func @transform_0(%arg0: i32) -> (i32, i32) {
    %c0_i32 = arith.constant 0 : i32
    %c0_i32_0 = arith.constant 0 : i32
    %c0_i32_1 = arith.constant 0 : i32
    return %c0_i32, %c0_i32_0 : i32, i32
  }
  func.func @transform_1(%arg0: i32) -> (i32, i32) {
    %c0_i32 = arith.constant 0 : i32
    %c0_i32_0 = arith.constant 0 : i32
    %c0_i32_1 = arith.constant 0 : i32
    return %c0_i32, %c0_i32_0 : i32, i32
  }
  func.func @transform_2(%arg0: i32) -> (i32, i32) {
    %c0_i32 = arith.constant 0 : i32
    %c0_i32_0 = arith.constant 0 : i32
    %c0_i32_1 = arith.constant 0 : i32
    return %c0_i32, %c0_i32_0 : i32, i32
  }
  func.func @transform_3(%arg0: i32) -> (i32, i32) {
    %c0_i32 = arith.constant 0 : i32
    %c0_i32_0 = arith.constant 0 : i32
    %c0_i32_1 = arith.constant 0 : i32
    return %c0_i32, %c0_i32_0 : i32, i32
  }
  func.func @transform_4(%arg0: i32) -> (i32, i32) {
    %c0_i32 = arith.constant 0 : i32
    %c0_i32_0 = arith.constant 0 : i32
    %c0_i32_1 = arith.constant 0 : i32
    return %c0_i32, %c0_i32_0 : i32, i32
  }
  func.func @transform_5(%arg0: i32) -> (i32, i32) {
    %c0_i32 = arith.constant 0 : i32
    %c0_i32_0 = arith.constant 0 : i32
    %c0_i32_1 = arith.constant 0 : i32
    return %c0_i32, %c0_i32_0 : i32, i32
  }
  func.func @transform_6(%arg0: i32) -> (i32, i32) {
    %c0_i32 = arith.constant 0 : i32
    %c0_i32_0 = arith.constant 0 : i32
    %c0_i32_1 = arith.constant 0 : i32
    return %c0_i32, %c0_i32_0 : i32, i32
  }
  func.func @transform_7(%arg0: i32) -> (i32, i32) {
    %c0_i32 = arith.constant 0 : i32
    %c0_i32_0 = arith.constant 0 : i32
    return %c0_i32, %arg0 : i32, i32
  }
  func.func @transform_8(%arg0: i32) -> (i32, i32) {
    %c0_i32 = arith.constant 0 : i32
    %c0_i32_0 = arith.constant 0 : i32
    return %c0_i32, %arg0 : i32, i32
  }
  func.func @transform_9(%arg0: i32) -> (i32, i32) {
    %c0_i32 = arith.constant 0 : i32
    %c0_i32_0 = arith.constant 0 : i32
    return %c0_i32, %arg0 : i32, i32
  }
}

</mosaic_0001>

<bundles_post_ra>
// kernel: tpu_custom_call.1
= control target key start
LH: loop header
LB: loop body
LE: loop exit
PB: predicated region body
PF: predicated region fallthrough
CT: control target
= control target key end

     0   :  { %14 = vsyncpa [#allocation4], 0  ;;  %s1177_s0 = inlined_call_operand.hbm [shape: f32[8,128], index: 0, kind: input, shape index: {}]   ;;  %s1178_s1 = inlined_call_operand.hbm [shape: f32[128,128], index: 1, kind: input, shape index: {}]   ;;  %s1179_s2 = inlined_call_operand.vmem [shape: f32[1,128], index: 2, kind: input, shape index: {}]   ;;  %s1180_s3 = inlined_call_operand.vmem [shape: f32[1,128], index: 3, kind: input, shape index: {}]   ;;  %s1181_s4 = inlined_call_operand.hbm [shape: f32[256,128], index: 4, kind: input, shape index: {}]   ;;  %s1182_s5 = inlined_call_operand.vmem [shape: f32[1,128], index: 5, kind: input, shape index: {}]   ;;  %s1183_s6 = inlined_call_operand.vmem [shape: f32[1,128], index: 6, kind: input, shape index: {}]   ;;  %s1184_s7 = inlined_call_operand.hbm [shape: f32[384,128], index: 7, kind: input, shape index: {}]   ;;  %s1185_s8 = inlined_call_operand.vmem [shape: f32[1,128], index: 8, kind: input, shape index: {}]   ;;  %s1186_s9 = inlined_call_operand.hbm [shape: f32[8,128], index: 9, kind: output, shape index: {}]  }
   0x1   :  { %15 = vsyncpa [#allocation7], 0 }
   0x2   :  { %16 = vsyncpa [#allocation10], 0 }
   0x3   :  { %17 = vsyncpa [#allocation5], 0  ;;  %s1001_s30 = smov [#allocation6]   ;;  %s883_s13 = scalar_lea.hbm %s1178_s1, 2048 }
   0x4   :  { %s33_s10 = sshll.u32 %s1001_s30, 4  ;;  %p884_p0 = scmp.ne.s32.totalorder %s1178_s1, %s883_s13  ;;  %s34_s10 = int_to_ptr.vmem [resolvable:$true] %s33_s10 }
   0x5   :  { %p887_p1 = scmp.lt.u32.totalorder %s883_s13, %s1178_s1 }
   0x7   :  { %p889_p2 = pnand %p887_p1, %p884_p0 }
   0x9   :  { %892 = shalt.err (!%p889_p2)
}
   0xa   :  { %s893_s18 = scalar_lea.vmem %s34_s10, 2048  ;;  %p898_p4 = scmp.lt.s32.totalorder %s34_s10, %s34_s10 }
   0xb   :  { %p894_p3 = scmp.ne.s32.totalorder %s34_s10, %s893_s18  ;;  %p899_p5 = scmp.lt.s32.totalorder %s893_s18, %s893_s18 }
   0xd   :  { %p900_p6 = por %p899_p5, %p898_p4 }
   0xf   :  { %p901_p7 = pnand %p900_p6, %p894_p3 }
  0x11   :  { %904 = shalt.err (!%p901_p7)
}
  0x12   :  { %s1002_s19 = smov 128   ;;  %s1003_s20 = smov 8  }
  0x13   :  { %39 = dma.hbm_to_vmem [thread:$0]  %s1178_s1, 2048, %s34_s10, [#allocation7], %s1002_s19, %s1002_s19, %s1003_s20  }
  0x14   :  { %s1004_s23 = smov [#allocation3]   ;;  %s1005_s25 = smov [#allocation8]  }
  0x15   :  { %s24_s24 = sshll.u32 %s1004_s23, 4  ;;  %s49_s26 = sshll.u32 %s1005_s25, 4  ;;  %s25_s24 = int_to_ptr.vmem [resolvable:$true] %s24_s24  ;;  %s50_s26 = int_to_ptr.vmem [resolvable:$true] %s49_s26 }
  0x16   :  { %s905_s29 = scalar_lea.hbm %s1177_s0, 128 }
  0x17   :  { %p906_p8 = scmp.ne.s32.totalorder %s1177_s0, %s905_s29  ;;  %p909_p9 = scmp.lt.u32.totalorder %s905_s29, %s1177_s0 }
  0x19   :  { %p911_p10 = pnand %p909_p9, %p906_p8 }
  0x1b   :  { %914 = shalt.err (!%p911_p10)
}
  0x1c   :  { %s915_s1 = scalar_lea.vmem %s25_s24, 128  ;;  %p920_p12 = scmp.lt.s32.totalorder %s25_s24, %s25_s24 }
  0x1d   :  { %p916_p11 = scmp.ne.s32.totalorder %s25_s24, %s915_s1  ;;  %p921_p13 = scmp.lt.s32.totalorder %s915_s1, %s915_s1 }
  0x1f   :  { %p922_p0 = por %p921_p13, %p920_p12 }
  0x21   :  { %p923_p1 = pnand %p922_p0, %p916_p11 }
  0x23   :  { %926 = shalt.err (!%p923_p1)
}
  0x24   :  { %27 = dma.hbm_to_vmem [thread:$0]  %s1177_s0, 128, %s25_s24, [#allocation4]  }
  0x25   :  { %s927_s17 = scalar_lea.hbm %s1181_s4, 4096 }
  0x26   :  { %p928_p2 = scmp.ne.s32.totalorder %s1181_s4, %s927_s17  ;;  %p931_p3 = scmp.lt.u32.totalorder %s927_s17, %s1181_s4 }
  0x28   :  { %p933_p4 = pnand %p931_p3, %p928_p2 }
  0x2a   :  { %936 = shalt.err (!%p933_p4)
}
  0x2b   :  { %s937_s25 = scalar_lea.vmem %s50_s26, 4096  ;;  %p942_p6 = scmp.lt.s32.totalorder %s50_s26, %s50_s26 }
  0x2c   :  { %p938_p5 = scmp.ne.s32.totalorder %s50_s26, %s937_s25  ;;  %p943_p7 = scmp.lt.s32.totalorder %s937_s25, %s937_s25 }
  0x2e   :  { %p944_p8 = por %p943_p7, %p942_p6 }
  0x30   :  { %p945_p9 = pnand %p944_p8, %p938_p5 }
  0x32   :  { %948 = shalt.err (!%p945_p9)
}
  0x33   :  { %55 = dma.hbm_to_vmem [thread:$0]  %s1181_s4, 4096, %s50_s26, [#allocation7], %s1002_s19, %s1002_s19, %s1003_s20  }
  0x34   :  { %s1006_s27 = smov [#allocation9]   ;;  %s949_s11 = scalar_lea.hbm %s1184_s7, 6144 }
  0x35   :  { %s65_s28 = sshll.u32 %s1006_s27, 4  ;;  %p950_p10 = scmp.ne.s32.totalorder %s1184_s7, %s949_s11  ;;  %s66_s28 = int_to_ptr.vmem [resolvable:$true] %s65_s28 }
  0x36   :  { %p953_p11 = scmp.lt.u32.totalorder %s949_s11, %s1184_s7 }
  0x38   :  { %p955_p12 = pnand %p953_p11, %p950_p10 }
  0x3a   :  { %958 = shalt.err (!%p955_p12)
}
  0x3b   :  { %s959_s14 = scalar_lea.vmem %s66_s28, 6144  ;;  %p964_p0 = scmp.lt.s32.totalorder %s66_s28, %s66_s28 }
  0x3c   :  { %p960_p13 = scmp.ne.s32.totalorder %s66_s28, %s959_s14  ;;  %p965_p1 = scmp.lt.s32.totalorder %s959_s14, %s959_s14 }
  0x3e   :  { %p966_p2 = por %p965_p1, %p964_p0 }
  0x40   :  { %p967_p3 = pnand %p966_p2, %p960_p13 }
  0x42   :  { %970 = shalt.err (!%p967_p3)
}
  0x43   :  { %71 = dma.hbm_to_vmem [thread:$0]  %s1184_s7, 6144, %s66_s28, [#allocation10], %s1002_s19, %s1002_s19, %s1003_s20  }
  0x44   :  { %993 = dma.done.wait [#allocation4], 128  }
  0x45   :  { %994 = vsyncadd [#allocation4], 4294967168 }
  0x46   :  { %995 = dma.done.wait [#allocation7], 6144  }
  0x47   :  { %996 = vsyncadd [#allocation7], 4294961152 }
  0x48   :  { %997 = dma.done.wait [#allocation10], 6144  }
  0x49   :  { %998 = vsyncadd [#allocation10], 4294961152  ;;  %v1007_v0 = vmov 0.0|0.0   ;;  %vm1008_vm0 = vmmov 0   ;;  %v1009_v1 = vmov 0.0   ;;  %v93_v2 = vld [vmem:[#allocation6] sm:$0xff] }
  0x4a   :  { %757 = vmatprep.subr.bf16.mxu0 %v1007_v0  ;;  %719 = vmatprep.mubr.msk.f32.mxu0 %vm1008_vm0, %v1009_v1  ;;  %v94_v3 = vld [vmem:[#allocation6 + $0x8] sm:$0xff]  ;;  %v95_v4 = vld [vmem:[#allocation6 + $0x10] sm:$0xff]  ;;  %v96_v6 = vld [vmem:[#allocation6 + $0x18] sm:$0xff] }
  0x4b   :  { %v758_v5 = vpack.c.bf16 %v94_v3, %v93_v2  ;;  %v761_v7 = vpack.c.bf16 %v96_v6, %v95_v4  ;;  %v97_v8 = vld [vmem:[#allocation6 + $0x20] sm:$0xff]  ;;  %v98_v9 = vld [vmem:[#allocation6 + $0x28] sm:$0xff]  ;;  %v99_v11 = vld [vmem:[#allocation6 + $0x30] sm:$0xff] }
  0x4c   :  { %v764_v10 = vpack.c.bf16 %v98_v9, %v97_v8  ;;  %v100_v12 = vld [vmem:[#allocation6 + $0x38] sm:$0xff]  ;;  %v101_v14 = vld [vmem:[#allocation6 + $0x40] sm:$0xff]  ;;  %v102_v15 = vld [vmem:[#allocation6 + $0x48] sm:$0xff] }
  0x4d   :  { %759 = vmatpush3.bf16.msra.mxu0 %v758_v5  ;;  %v767_v13 = vpack.c.bf16 %v100_v12, %v99_v11  ;;  %v770_v16 = vpack.c.bf16 %v102_v15, %v101_v14  ;;  %v103_v17 = vld [vmem:[#allocation6 + $0x50] sm:$0xff]  ;;  %v104_v18 = vld [vmem:[#allocation6 + $0x58] sm:$0xff]  ;;  %v105_v20 = vld [vmem:[#allocation6 + $0x60] sm:$0xff] }
  0x4e   :  { %760 = vmatprep.subr.bf16.mxu0 %v1007_v0  ;;  %v773_v19 = vpack.c.bf16 %v104_v18, %v103_v17  ;;  %v106_v21 = vld [vmem:[#allocation6 + $0x68] sm:$0xff]  ;;  %v107_v23 = vld [vmem:[#allocation6 + $0x70] sm:$0xff]  ;;  %v108_v24 = vld [vmem:[#allocation6 + $0x78] sm:$0xff] }
  0x4f   :  { %v776_v22 = vpack.c.bf16 %v106_v21, %v105_v20  ;;  %v779_v25 = vpack.c.bf16 %v108_v24, %v107_v23  ;;  %v1128_v26 = vld [vmem:[#allocation3] sm:$0xff]  ;;  %v238_v27 = vld [vmem:[#allocation8 + $0x80] sm:$0xff]  ;;  %v239_v28 = vld [vmem:[#allocation8 + $0x88] sm:$0xff] }
  0x50   :  { %v781_v29 = vpack.c.bf16 %v239_v28, %v238_v27  ;;  %v222_v30 = vld [vmem:[#allocation8] sm:$0xff]  ;;  %v223_v31 = vld [vmem:[#allocation8 + $0x8] sm:$0xff]  ;;  %v240_v33 = vld [vmem:[#allocation8 + $0x90] sm:$0xff] }
  0x51   :  { %762 = vmatpush3.bf16.msra.mxu0 %v761_v7  ;;  %v783_v32 = vpack.c.bf16 %v223_v31, %v222_v30  ;;  %v241_v34 = vld [vmem:[#allocation8 + $0x98] sm:$0xff]  ;;  %v224_v36 = vld [vmem:[#allocation8 + $0x10] sm:$0xff]  ;;  %v242_v39 = vld [vmem:[#allocation8 + $0xa0] sm:$0xff] }
  0x52   :  { %763 = vmatprep.subr.bf16.mxu0 %v1007_v0  ;;  %782 = vmatprep.subr.bf16.mxu1 %v781_v29  ;;  %v785_v35 = vpack.c.bf16 %v241_v34, %v240_v33  ;;  %v225_v37 = vld [vmem:[#allocation8 + $0x18] sm:$0xff]  ;;  %v243_v40 = vld [vmem:[#allocation8 + $0xa8] sm:$0xff]  ;;  %v226_v42 = vld [vmem:[#allocation8 + $0x20] sm:$0xff] }
  0x53   :  { %784 = vmatpush3.bf16.msra.mxu1 %v783_v32  ;;  %v787_v38 = vpack.c.bf16 %v225_v37, %v224_v36  ;;  %v789_v41 = vpack.c.bf16 %v243_v40, %v242_v39  ;;  %v227_v43 = vld [vmem:[#allocation8 + $0x28] sm:$0xff]  ;;  %v244_v45 = vld [vmem:[#allocation8 + $0xb0] sm:$0xff]  ;;  %v245_v46 = vld [vmem:[#allocation8 + $0xb8] sm:$0xff] }
  0x54   :  { %786 = vmatprep.subr.bf16.mxu1 %v785_v35  ;;  %v791_v44 = vpack.c.bf16 %v227_v43, %v226_v42  ;;  %v793_v47 = vpack.c.bf16 %v245_v46, %v244_v45  ;;  %v228_v48 = vld [vmem:[#allocation8 + $0x30] sm:$0xff]  ;;  %v229_v49 = vld [vmem:[#allocation8 + $0x38] sm:$0xff]  ;;  %v246_v50 = vld [vmem:[#allocation8 + $0xc0] sm:$0xff]  ;;  %v204_v35 = vlaneseq }
  0x55   :  { %765 = vmatpush3.bf16.msra.mxu0 %v764_v10  ;;  %v795_v51 = vpack.c.bf16 %v229_v49, %v228_v48  ;;  %v247_v52 = vld [vmem:[#allocation8 + $0xc8] sm:$0xff]  ;;  %v230_v53 = vld [vmem:[#allocation8 + $0x40] sm:$0xff]  ;;  %v248_v56 = vld [vmem:[#allocation8 + $0xd0] sm:$0xff] }
  0x56   :  { %766 = vmatprep.subr.bf16.mxu0 %v1007_v0  ;;  %v231_v54 = vld [vmem:[#allocation8 + $0x48] sm:$0xff]  ;;  %v797_v55 = vpack.c.bf16 %v247_v52, %v246_v50  ;;  %v249_v57 = vld [vmem:[#allocation8 + $0xd8] sm:$0xff]  ;;  %v232_v60 = vld [vmem:[#allocation8 + $0x50] sm:$0xff]  ;;  %v1132_v36 = vshrl.u32 %v204_v35, 7 }
  0x57   :  { %788 = vmatpush3.bf16.msra.mxu1 %v787_v38  ;;  %v799_v58 = vpack.c.bf16 %v231_v54, %v230_v53  ;;  %v801_v59 = vpack.c.bf16 %v249_v57, %v248_v56  ;;  %v233_v61 = vld [vmem:[#allocation8 + $0x58] sm:$0xff]  ;;  %v250_v62 = vld [vmem:[#allocation8 + $0xe0] sm:$0xff]  ;;  %v251_v63 = vld [vmem:[#allocation8 + $0xe8] sm:$0xff] }
  0x58   :  { %790 = vmatprep.subr.bf16.mxu1 %v789_v41  ;;  %v803_v2 = vpack.c.bf16 %v233_v61, %v232_v60  ;;  %v805_v3 = vpack.c.bf16 %v251_v63, %v250_v62  ;;  %v234_v4 = vld [vmem:[#allocation8 + $0x60] sm:$0xff]  ;;  %v235_v5 = vld [vmem:[#allocation8 + $0x68] sm:$0xff]  ;;  %v252_v6 = vld [vmem:[#allocation8 + $0xf0] sm:$0xff]  ;;  %v206_v38 = vsub.s32 0, %v1132_v36 }
  0x59   :  { %768 = vmatpush3.bf16.msra.mxu0 %v767_v13  ;;  %v253_v7 = vld [vmem:[#allocation8 + $0xf8] sm:$0xff]  ;;  %v807_v8 = vpack.c.bf16 %v235_v5, %v234_v4  ;;  %v236_v10 = vld [vmem:[#allocation8 + $0x70] sm:$0xff]  ;;  %v384_v48 = vld [vmem:[#allocation9 + $0x88] sm:$0xff] }
  0x5a   :  { %769 = vmatprep.subr.bf16.mxu0 %v1007_v0  ;;  %v809_v9 = vpack.c.bf16 %v253_v7, %v252_v6  ;;  %v237_v11 = vld [vmem:[#allocation8 + $0x78] sm:$0xff]  ;;  %v367_v50 = vld [vmem:[#allocation9] sm:$0xff]  ;;  %v385_v53 = vld [vmem:[#allocation9 + $0x90] sm:$0xff] }
  0x5b   :  { %792 = vmatpush3.bf16.msra.mxu1 %v791_v44  ;;  %v811_v12 = vpack.c.bf16 %v237_v11, %v236_v10  ;;  %v198_v37 = vld [vmem:[%s1179_s2] sm:$0x1]  ;;  %v369_v56 = vld [vmem:[#allocation9 + $0x10] sm:$0xff]  ;;  %v400_v60 = vld [vmem:[#allocation9 + $0x108] sm:$0xff] }
  0x5c   :  { %794 = vmatprep.subr.bf16.mxu1 %v793_v47  ;;  %v580_v43 = vld [vmem:[%s1180_s3] ss:$0 sm:$0xff]  ;;  %v383_v47 = vld [vmem:[#allocation9 + $0x80] sm:$0xff]  ;;  %v388_v62 = vld [vmem:[#allocation9 + $0xa8] sm:$0xff] }
  0x5d   :  { %771 = vmatpush3.bf16.msra.mxu0 %v770_v16  ;;  %v813_v49 = vpack.c.bf16 %v384_v48, %v383_v47  ;;  %v386_v54 = vld [vmem:[#allocation9 + $0x98] sm:$0xff]  ;;  %v401_v5 = vld [vmem:[#allocation9 + $0x110] sm:$0xff] }
  0x5e   :  { %772 = vmatprep.subr.bf16.mxu0 %v1007_v0  ;;  %v370_v57 = vld [vmem:[#allocation9 + $0x18] sm:$0xff]  ;;  %v373_v11 = vld [vmem:[#allocation9 + $0x30] sm:$0xff] }
  0x5f   :  { %796 = vmatpush3.bf16.msra.mxu1 %v795_v51  ;;  %v368_v51 = vld [vmem:[#allocation9 + $0x8] sm:$0xff]  ;;  %v402_v6 = vld [vmem:[#allocation9 + $0x118] sm:$0xff] }
  0x60   :  { %798 = vmatprep.subr.bf16.mxu1 %v797_v55  ;;  %v815_v52 = vpack.c.bf16 %v368_v51, %v367_v50  ;;  %v817_v55 = vpack.c.bf16 %v386_v54, %v385_v53  ;;  %v849_v7 = vpack.c.bf16 %v402_v6, %v401_v5  ;;  %v398_v47 = vld [vmem:[#allocation9 + $0xf8] sm:$0xff]  ;;  %v412_v53 = vld [vmem:[#allocation9 + $0x168] sm:$0xff] }
  0x61   :  { %774 = vmatpush3.bf16.msra.mxu0 %v773_v19  ;;  %v382_v50 = vld [vmem:[#allocation9 + $0x78] sm:$0xff] }
  0x62   :  { %775 = vmatprep.subr.bf16.mxu0 %v1007_v0 }
  0x63   :  { %800 = vmatpush3.bf16.msra.mxu1 %v799_v58  ;;  %v819_v58 = vpack.c.bf16 %v370_v57, %v369_v56  ;;  %v413_v56 = vld [vmem:[#allocation9 + $0x170] sm:$0xff]  ;;  %v414_v57 = vld [vmem:[#allocation9 + $0x178] sm:$0xff] }
  0x64   :  { %802 = vmatprep.subr.bf16.mxu1 %v801_v59  ;;  %v399_v59 = vld [vmem:[#allocation9 + $0x100] sm:$0xff] }
  0x65   :  { %777 = vmatpush3.bf16.msra.mxu0 %v776_v22  ;;  %v846_v61 = vpack.c.bf16 %v400_v60, %v399_v59 }
  0x66   :  { %778 = vmatprep.subr.bf16.mxu0 %v1007_v0 }
  0x67   :  { %804 = vmatpush3.bf16.msra.mxu1 %v803_v2  ;;  %v371_v2 = vld [vmem:[#allocation9 + $0x20] sm:$0xff] }
  0x68   :  { %806 = vmatprep.subr.bf16.mxu1 %v805_v3  ;;  %v372_v3 = vld [vmem:[#allocation9 + $0x28] sm:$0xff] }
  0x69   :  { %780 = vmatpush3.bf16.msra.mxu0 %v779_v25  ;;  %v823_v4 = vpack.c.bf16 %v372_v3, %v371_v2 }
  0x6a   :  { %814 = vmatprep.subr.bf16.mxu0 %v813_v49  ;;  %v381_v49 = vld [vmem:[#allocation9 + $0x70] sm:$0xff] }
  0x6b   :  { %808 = vmatpush3.bf16.msra.mxu1 %v807_v8  ;;  %v389_v8 = vld [vmem:[#allocation9 + $0xb0] sm:$0xff]  ;;  %v843_v54 = vpack.c.bf16 %v382_v50, %v381_v49 }
  0x6c   :  { %720 = vmatmul.mubr.f32.vlgmr.msra.gmra.mrb[0].mxu0 %v1128_v26  ;;  %810 = vmatprep.subr.bf16.mxu1 %v809_v9  ;;  %v390_v9 = vld [vmem:[#allocation9 + $0xb8] sm:$0xff] }
  0x6d   :  { %816 = vmatpush3.bf16.msra.mxu0 %v815_v52  ;;  %v825_v10 = vpack.c.bf16 %v390_v9, %v389_v8  ;;  %v411_v52 = vld [vmem:[#allocation9 + $0x160] sm:$0xff] }
  0x6e   :  { %818 = vmatprep.subr.bf16.mxu0 %v817_v55  ;;  %v864_v55 = vpack.c.bf16 %v412_v53, %v411_v52 }
  0x6f   :  { %812 = vmatpush3.bf16.msra.mxu1 %v811_v12  ;;  %v374_v12 = vld [vmem:[#allocation9 + $0x38] sm:$0xff] }
  0x70   :  { %845 = vmatprep.subr.bf16.mxu1 %v1007_v0 }
  0x71   :  { %820 = vmatpush3.bf16.msra.mxu0 %v819_v58  ;;  %v867_v58 = vpack.c.bf16 %v414_v57, %v413_v56 }
 0x13f   :  { %v175_v13 = vpop.f32.mrb[0].mxu0 }
 0x140   :  { %v179_v14 = vrot.slane %v175_v13, 4  ;;  %v187_v15 = vmul.f32 %v175_v13, %v175_v13  ;;  %v721_v16 = vpop.f32.mrb[1].mxu0 }
 0x142   :  { %v180_v17 = vadd.f32 %v179_v14, %v175_v13  ;;  %v188_v18 = vrot.slane %v187_v15, 4  ;;  %v403_v14 = vld [vmem:[#allocation9 + $0x120] sm:$0xff] }
 0x144   :  { %v181_v19 = vrot.slane %v180_v17, 2  ;;  %v189_v20 = vadd.f32 %v188_v18, %v187_v15  ;;  %v404_v15 = vld [vmem:[#allocation9 + $0x128] sm:$0xff] }
 0x145   :  { %v852_v16 = vpack.c.bf16 %v404_v15, %v403_v14  ;;  %v392_v18 = vld [vmem:[#allocation9 + $0xc8] sm:$0xff] }
 0x146   :  { %v182_v21 = vadd.f32 %v181_v19, %v180_v17  ;;  %v190_v22 = vrot.slane %v189_v20, 2  ;;  %v391_v17 = vld [vmem:[#allocation9 + $0xc0] sm:$0xff] }
 0x147   :  { %v829_v19 = vpack.c.bf16 %v392_v18, %v391_v17 }
 0x148   :  { %v183_v23 = vrot.slane %v182_v21, 1  ;;  %v191_v24 = vadd.f32 %v190_v22, %v189_v20  ;;  %v375_v20 = vld [vmem:[#allocation9 + $0x40] sm:$0xff] }
 0x14a   :  { %v184_v25 = vadd.f32 %v183_v23, %v182_v21  ;;  %v192_v27 = vrot.slane %v191_v24, 1  ;;  %v376_v21 = vld [vmem:[#allocation9 + $0x48] sm:$0xff]  ;;  %v405_v23 = vld [vmem:[#allocation9 + $0x130] sm:$0xff] }
 0x14b   :  { %v831_v22 = vpack.c.bf16 %v376_v21, %v375_v20  ;;  %v581_v21 = vld [vmem:[%s1183_s6] ss:$0 sm:$0xff] }
 0x14c   :  { %v186_v28 = vmul.f32 0.125, %v184_v25  ;;  %v193_v29 = vadd.f32 %v192_v27, %v191_v24  ;;  %v406_v24 = vld [vmem:[#allocation9 + $0x138] sm:$0xff]  ;;  %v393_v27 = vld [vmem:[#allocation9 + $0xd0] sm:$0xff] }
 0x14d   :  { %v855_v25 = vpack.c.bf16 %v406_v24, %v405_v23 }
 0x14e   :  { %v194_v30 = vmul.f32 0.125, %v193_v29  ;;  %v195_v31 = vmul.f32 %v186_v28, %v186_v28  ;;  %v202_v41 = vsub.f32 %v175_v13, %v186_v28  ;;  %v827_v13 = vpack.c.bf16 %v374_v12, %v373_v11  ;;  %v394_v28 = vld [vmem:[#allocation9 + $0xd8] sm:$0xff]  ;;  %v377_v29 = vld [vmem:[#allocation9 + $0x50] sm:$0xff] }
 0x150   :  { %v196_v32 = vsub.f32 %v194_v30, %v195_v31  ;;  %v833_v30 = vpack.c.bf16 %v394_v28, %v393_v27  ;;  %v378_v31 = vld [vmem:[#allocation9 + $0x58] sm:$0xff] }
 0x152   :  { %v197_v33 = vmax.f32 %v196_v32, 0.0  ;;  %v407_v32 = vld [vmem:[#allocation9 + $0x140] sm:$0xff] }
 0x154   :  { %v199_v34 = vadd.f32 1e-05, %v197_v33  ;;  %v408_v33 = vld [vmem:[#allocation9 + $0x148] sm:$0xff] }
 0x155   :  { %v858_v35 = vpack.c.bf16 %v408_v33, %v407_v32 }
 0x156   :  { %879 = vrsqrt.f32 %v199_v34  ;;  %v835_v34 = vpack.c.bf16 %v378_v31, %v377_v29  ;;  %v582_v29 = vld [vmem:[%s1185_s8] ss:$0 sm:$0xff] }
 0x160   :  { %v880_v39 = vpop.eup %879 }
 0x161   :  { %v201_v40 = vmul.f32 %v880_v39, %v198_v37  ;;  %v395_v37 = vld [vmem:[#allocation9 + $0xe0] sm:$0xff]  ;;  %v396_v39 = vld [vmem:[#allocation9 + $0xe8] sm:$0xff] }
 0x163   :  { %v207_v42 = vrot.slane %v201_v40, %v206_v38  ;;  %v379_v40 = vld [vmem:[#allocation9 + $0x60] sm:$0xff] }
 0x165   :  { %v209_v44 = vmul.f32 %v207_v42, %v202_v41  ;;  %v837_v41 = vpack.c.bf16 %v396_v39, %v395_v37  ;;  %v380_v42 = vld [vmem:[#allocation9 + $0x68] sm:$0xff] }
 0x167   :  { %v217_v45 = vadd.f32 %v580_v43, %v209_v44  ;;  %v409_v43 = vld [vmem:[#allocation9 + $0x150] sm:$0xff]  ;;  %v410_v44 = vld [vmem:[#allocation9 + $0x158] sm:$0xff] }
 0x168   :  { %v861_v51 = vpack.c.bf16 %v410_v44, %v409_v43 }
 0x169   :  { %v218_v46 = vmax.f32 %v217_v45, 0.0  ;;  %v839_v45 = vpack.c.bf16 %v380_v42, %v379_v40 }
 0x16b   :  { %318 = vmatprep.mubr.f32.mxu1 %v218_v46  ;;  %486 = vmatprep.mubr.f32.mxu0 %v218_v46  ;;  %v397_v46 = vld [vmem:[#allocation9 + $0xf0] sm:$0xff] }
 0x16c   :  { %319 = vmatmul.mubr.f32.vlgmr.msra.gmra.mrb[0].mxu1 %v1128_v26  ;;  %v841_v48 = vpack.c.bf16 %v398_v47, %v397_v46 }
 0x16d   :  { %754 = vmatprep.mubr.msk.f32.mxu1 %vm1008_vm0, %v1009_v1  ;;  %v387_v1 = vld [vmem:[#allocation9 + $0xa0] sm:$0xff]  ;;  %847 = vmatpush3.bf16.msra.mxu1 %v846_v61 }
 0x16e   :  { %v821_v63 = vpack.c.bf16 %v388_v62, %v387_v1  ;;  %848 = vmatprep.subr.bf16.mxu1 %v1007_v0 }
 0x170   :  { %822 = vmatprep.subr.bf16.mxu0 %v821_v63 }
 0x171   :  { %824 = vmatpush3.bf16.msra.mxu0 %v823_v4  ;;  %850 = vmatpush3.bf16.msra.mxu1 %v849_v7 }
 0x172   :  { %826 = vmatprep.subr.bf16.mxu0 %v825_v10  ;;  %851 = vmatprep.subr.bf16.mxu1 %v1007_v0 }
 0x175   :  { %828 = vmatpush3.bf16.msra.mxu0 %v827_v13  ;;  %853 = vmatpush3.bf16.msra.mxu1 %v852_v16  ;;  %v342_v16 = vld [vmem:[%s1182_s5] sm:$0x1]  ;;  %s1010_s5 = smov [#allocation11]  }
 0x176   :  { %830 = vmatprep.subr.bf16.mxu0 %v829_v19  ;;  %854 = vmatprep.subr.bf16.mxu1 %v1007_v0  ;;  %s569_s22 = sshll.u32 %s1010_s5, 4  ;;  %s570_s22 = int_to_ptr.vmem [resolvable:$true] %s569_s22 }
 0x177   :  { %s971_s6 = scalar_lea.vmem %s570_s22, 128  ;;  %p976_p5 = scmp.lt.s32.totalorder %s570_s22, %s570_s22 }
 0x178   :  { %p972_p4 = scmp.ne.s32.totalorder %s570_s22, %s971_s6  ;;  %p977_p6 = scmp.lt.s32.totalorder %s971_s6, %s971_s6 }
 0x179   :  { %832 = vmatpush3.bf16.msra.mxu0 %v831_v22  ;;  %856 = vmatpush3.bf16.msra.mxu1 %v855_v25 }
 0x17a   :  { %834 = vmatprep.subr.bf16.mxu0 %v833_v30  ;;  %857 = vmatprep.subr.bf16.mxu1 %v1007_v0  ;;  %p978_p7 = por %p977_p6, %p976_p5 }
 0x17c   :  { %p979_p8 = pnand %p978_p7, %p972_p4 }
 0x17d   :  { %836 = vmatpush3.bf16.msra.mxu0 %v835_v34  ;;  %859 = vmatpush3.bf16.msra.mxu1 %v858_v35 }
 0x17e   :  { %838 = vmatprep.subr.bf16.mxu0 %v837_v41  ;;  %860 = vmatprep.subr.bf16.mxu1 %v1007_v0 }
 0x181   :  { %840 = vmatpush3.bf16.msra.mxu0 %v839_v45  ;;  %862 = vmatpush3.bf16.msra.mxu1 %v861_v51 }
 0x182   :  { %842 = vmatprep.subr.bf16.mxu0 %v841_v48  ;;  %863 = vmatprep.subr.bf16.mxu1 %v1007_v0 }
 0x185   :  { %844 = vmatpush3.bf16.msra.mxu0 %v843_v54  ;;  %865 = vmatpush3.bf16.msra.mxu1 %v864_v55 }
 0x186   :  { %866 = vmatprep.subr.bf16.mxu1 %v1007_v0 }
 0x188   :  { %487 = vmatmul.mubr.f32.vlgmr.msra.gmra.mrb[2].mxu0 %v1128_v26 }
 0x189   :  { %868 = vmatpush3.bf16.msra.mxu1 %v867_v58 }
 0x23f   :  { %v632_v59 = vpop.f32.mrb[0].mxu1 }
 0x240   :  { %v633_v60 = vpop.f32.mrb[1].mxu1 }
 0x241   :  { %v634_v61 = vadd.f32 %v633_v60, %v632_v59 }
 0x243   :  { %v324_v1 = vrot.slane %v634_v61, 4  ;;  %v331_v62 = vmul.f32 %v634_v61, %v634_v61 }
 0x245   :  { %v325_v63 = vadd.f32 %v634_v61, %v324_v1  ;;  %v332_v2 = vrot.slane %v331_v62, 4 }
 0x247   :  { %v326_v3 = vrot.slane %v325_v63, 2  ;;  %v333_v4 = vadd.f32 %v332_v2, %v331_v62 }
 0x249   :  { %v327_v5 = vadd.f32 %v326_v3, %v325_v63  ;;  %v334_v6 = vrot.slane %v333_v4, 2 }
 0x24b   :  { %v328_v7 = vrot.slane %v327_v5, 1  ;;  %v335_v8 = vadd.f32 %v334_v6, %v333_v4 }
 0x24d   :  { %v329_v9 = vadd.f32 %v328_v7, %v327_v5  ;;  %v336_v10 = vrot.slane %v335_v8, 1 }
 0x24f   :  { %v330_v11 = vmul.f32 0.125, %v329_v9  ;;  %v337_v26 = vadd.f32 %v336_v10, %v335_v8 }
 0x251   :  { %v338_v12 = vmul.f32 0.125, %v337_v26  ;;  %v339_v0 = vmul.f32 %v330_v11, %v330_v11  ;;  %v346_v19 = vsub.f32 %v634_v61, %v330_v11 }
 0x253   :  { %v340_v13 = vsub.f32 %v338_v12, %v339_v0 }
 0x255   :  { %v341_v14 = vmax.f32 %v340_v13, 0.0 }
 0x257   :  { %v343_v15 = vadd.f32 1e-05, %v341_v14 }
 0x259   :  { %881 = vrsqrt.f32 %v343_v15 }
 0x25b   :  { %v667_v25 = vpop.f32.mrb[2].mxu0 }
 0x25c   :  { %v668_v27 = vpop.f32.mrb[3].mxu0 }
 0x25d   :  { %v669_v28 = vadd.f32 %v668_v27, %v667_v25 }
 0x25f   :  { %v489_v30 = vadd.f32 %v669_v28, %v582_v29 }
 0x263   :  { %v882_v17 = vpop.eup %881 }
 0x264   :  { %v345_v18 = vmul.f32 %v882_v17, %v342_v16 }
 0x266   :  { %v351_v20 = vrot.slane %v345_v18, %v206_v38 }
 0x268   :  { %v353_v22 = vmul.f32 %v351_v20, %v346_v19 }
 0x26a   :  { %v361_v23 = vadd.f32 %v581_v21, %v353_v22 }
 0x26c   :  { %v362_v24 = vmax.f32 %v361_v23, 0.0 }
 0x26e   :  { %755 = vmatmul.mubr.f32.vlgmr.msra.gmra.mrb[2].mxu1 %v362_v24 }
 0x341   :  { %v558_v36 = vpop.f32.mrb[2].mxu1 }
 0x342   :  { %v559_v38 = vadd.f32 %v558_v36, %v489_v30  ;;  %v756_v31 = vpop.f32.mrb[3].mxu1 }
 0x344   :  { %562 = vst [vmem:[#allocation11] sm:$0xff] %v559_v38 }
 0x345   :  { %982 = shalt.err (!%p979_p8)
}
 0x346   :  { %s983_s0 = scalar_lea.hbm %s1186_s9, 128 }
 0x347   :  { %p984_p9 = scmp.ne.s32.totalorder %s1186_s9, %s983_s0  ;;  %p987_p10 = scmp.lt.u32.totalorder %s983_s0, %s1186_s9 }
 0x349   :  { %p989_p11 = pnand %p987_p10, %p984_p9 }
 0x34b   :  { %992 = shalt.err (!%p989_p11)
}
 0x34c   :  { %572 = dma.vmem_to_hbm [thread:$0]  %s570_s22, 128, %s1186_s9, [#allocation5]  }
 0x34d   :  { %999 = dma.done.wait [#allocation5], 128  }
 0x34e   :  { %1000 = vsyncadd [#allocation5], 4294967168 }
 0x34f   :  { %576 = vsyncpa [#allocation4], 1 }
 0x350   :  { %577 = vsyncpa [#allocation7], 1 }
 0x351   :  { %578 = vsyncpa [#allocation10], 1 }
 0x352   :  { %579 = vsyncpa [#allocation5], 1 }

</bundles_post_ra>
